<compile_context>
chip_gen: v5e
topology: v5e:2x2
jax: 0.10.0
libtpu: 0.0.40
codegen_flags: <defaults>
</compile_context>

<pallas_src>
import functools

import jax
import jax.numpy as jnp
from jax.experimental import pallas as pl
from jax.experimental.pallas import tpu as pltpu


def merge_kernel(x_ref, w_ref, b_ref, out_ref):
    # x_ref   : (K, TB)   feature-major activation slab, K = E + 2H
    # w_ref   : (2H, K)   stacked [merge ; merge_g] nn.Linear weights
    # b_ref   : (2H, 1)   stacked biases
    # out_ref : (H, TB)   merged sub-tree representation (transposed)
    H = out_ref.shape[0]
    # One K=E+2H matmul computes both linear heads; f32, exact precision
    # (latency-bound at these shapes, so the extra MXU passes are free).
    gates = jnp.dot(w_ref[...], x_ref[...],
                    preferred_element_type=jnp.float32,
                    precision=jax.lax.Precision.HIGHEST) + b_ref[...]
    sub_tree = jnp.tanh(gates[:H, :])               # merge head
    sub_tree_g = jax.nn.sigmoid(gates[H:, :])       # merge_g head (gate)
    out_ref[...] = (sub_tree * sub_tree_g).astype(out_ref.dtype)


def pack_merge_params(params):
    """One-time weight packing, hoisted out of the per-node forward path.

    torch nn.Linear weights are (out, in); stacking the two heads along `out`
    gives exactly the (2H, K) operand needed for gates^T = W @ x^T -- no
    transpose required.  Kept in f32 for tight parity with the reference.
    """
    w_packed = jnp.concatenate(
        [params["w_merge"], params["w_merge_g"]], axis=0).astype(jnp.float32)
    b_packed = jnp.concatenate(
        [params["b_merge"], params["b_merge_g"]]).reshape(-1, 1).astype(jnp.float32)
    return w_packed, b_packed


def _round_up(x, m):
    return (x + m - 1) // m * m


@functools.partial(jax.jit, static_argnames=("block_b",))
def merge_forward(node_embedding, sub_tree_1, sub_tree_2, w_packed, b_packed,
                  *, block_b=512):
    B, E = node_embedding.shape
    H = sub_tree_1.shape[1]
    K = E + 2 * H

    # torch.cat replacement: a single lane-dense concat + transpose in the
    # wrapper (layout plumbing only).  Ragged B handled by zero-padding; the
    # padded rows produce garbage outputs that are sliced off below.
    block_b = max(128, _round_up(block_b, 128))
    tile = min(block_b, _round_up(B, 128))       # whole batch in one step if small
    B_pad = _round_up(B, tile)

    x = jnp.concatenate([node_embedding, sub_tree_1, sub_tree_2], axis=1)  # (B, K)
    x = jnp.pad(x, ((0, B_pad - B), (0, 0)))
    xT = x.T.astype(jnp.float32)                 # (K, B_pad): batch on lanes

    cost = pl.CostEstimate(
        flops=2 * B_pad * K * 2 * H + 3 * B_pad * H,
        transcendentals=2 * B_pad * H,
        bytes_accessed=4 * (K * B_pad + 2 * H * K + 2 * H + H * B_pad),
    )

    grid_spec = pltpu.PrefetchScalarGridSpec(
        num_scalar_prefetch=0,
        grid=(B_pad // tile,),
        in_specs=[
            pl.BlockSpec((K, tile), lambda i: (0, i)),      # activation slab
            pl.BlockSpec((2 * H, K), lambda i: (0, 0)),     # weights stay resident
            pl.BlockSpec((2 * H, 1), lambda i: (0, 0)),     # bias stays resident
        ],
        out_specs=pl.BlockSpec((H, tile), lambda i: (0, i)),
    )
    out_t = pl.pallas_call(
        merge_kernel,
        out_shape=jax.ShapeDtypeStruct((H, B_pad), jnp.float32),
        grid_spec=grid_spec,
        compiler_params=pltpu.CompilerParams(
            dimension_semantics=("parallel",)),   # shards node batch across TCs
        cost_estimate=cost,
    )(xT, w_packed, b_packed)
    return out_t.T[:B]                            # (B, H), module's layout


def merge_ref(node_embedding, sub_tree_1, sub_tree_2, params):
    """Pure-JAX reference matching the PyTorch forward (eval mode), full f32."""
    inp = jnp.concatenate([node_embedding, sub_tree_1, sub_tree_2], axis=1)
    hi = jax.lax.Precision.HIGHEST
    sub_tree = jnp.tanh(
        jnp.dot(inp, params["w_merge"].T, precision=hi) + params["b_merge"])
    sub_tree_g = jax.nn.sigmoid(
        jnp.dot(inp, params["w_merge_g"].T, precision=hi) + params["b_merge_g"])
    return sub_tree * sub_tree_g


if __name__ == "__main__":
    H, E = 32, 64            # hidden_size, embedding_size -> K = 2H + E = 128
    B = 16                   # batched tree nodes (the torch module is B=1 per call)
    fan_in = 2 * H + E
    bound = 1.0 / fan_in ** 0.5

    key = jax.random.PRNGKey(0)
    k = iter(jax.random.split(key, 8))
    params = {
        "w_merge":   jax.random.uniform(next(k), (H, fan_in), jnp.float32, -bound, bound),
        "b_merge":   jax.random.uniform(next(k), (H,), jnp.float32, -bound, bound),
        "w_merge_g": jax.random.uniform(next(k), (H, fan_in), jnp.float32, -bound, bound),
        "b_merge_g": jax.random.uniform(next(k), (H,), jnp.float32, -bound, bound),
    }

    node_embedding = jax.random.normal(next(k), (B, E), jnp.float32)
    sub_tree_1 = jax.random.normal(next(k), (B, H), jnp.float32)
    sub_tree_2 = jax.random.normal(next(k), (B, H), jnp.float32)

    # TODO(synk): nn.Dropout(0.5) is identity in eval mode; training-mode
    # stochastic masking (pltpu.prng_*) is not implemented here.
    w_packed, b_packed = pack_merge_params(params)   # one-time, outside hot loop

    out = jax.block_until_ready(
        merge_forward(node_embedding, sub_tree_1, sub_tree_2, w_packed, b_packed))
    out_ref = merge_ref(node_embedding, sub_tree_1, sub_tree_2, params)

    assert out.shape == (B, H)
    max_err = float(jnp.max(jnp.abs(out - out_ref)))
    # f32 matmul path -> far tighter than the previous bf16-level 2e-2 check.
    assert jnp.allclose(out, out_ref, atol=1e-3, rtol=1e-3), max_err
    print("KERNEL_OK")
</pallas_src>

<mosaic_0001>
module attributes {stable_mosaic.version = 11 : i64} {
  func.func @merge_kernel(%arg0: i32, %arg1: memref<128x128xf32, #tpu.memory_space<vmem>>, %arg2: memref<64x128xf32, #tpu.memory_space<vmem>>, %arg3: memref<64x1xf32, #tpu.memory_space<vmem>>, %arg4: memref<32x128xf32, #tpu.memory_space<vmem>>) attributes {dimension_semantics = [#tpu.dimension_semantics<parallel>], iteration_bounds = array<i64: 1>, scalar_prefetch = 0 : i64, scratch_operands = 0 : i64, tpu.core_type = #tpu.core_type<tc>, window_params = [{transform_indices = @transform_0, window_bounds = array<i64: 128, 128>}, {pipeline_mode = #tpu.pipeline_mode<synchronous>, transform_indices = @transform_1, window_bounds = array<i64: 64, 128>}, {pipeline_mode = #tpu.pipeline_mode<synchronous>, transform_indices = @transform_2, window_bounds = array<i64: 64, 1>}, {transform_indices = @transform_3, window_bounds = array<i64: 32, 128>}]} {
    %c0 = arith.constant 0 : index
    %c0_0 = arith.constant 0 : index
    %0 = vector.load %arg2[%c0, %c0_0] : memref<64x128xf32, #tpu.memory_space<vmem>>, vector<64x128xf32>
    %c0_1 = arith.constant 0 : index
    %c0_2 = arith.constant 0 : index
    %1 = vector.load %arg1[%c0_1, %c0_2] : memref<128x128xf32, #tpu.memory_space<vmem>>, vector<128x128xf32>
    %cst = arith.constant dense<0.000000e+00> : vector<64x128xf32>
    %2 = tpu.matmul %0, %1, %cst {dimension_numbers = #tpu.dot_dimension_numbers<[1], [0], [0], [1], [0, 0, 1, 1], [], []>, precision = #tpu.contract_precision<fp32>} : vector<64x128xf32>, vector<128x128xf32>, vector<64x128xf32> -> vector<64x128xf32>
    %c0_3 = arith.constant 0 : index
    %c0_4 = arith.constant 0 : index
    %3 = vector.load %arg3[%c0_3, %c0_4] : memref<64x1xf32, #tpu.memory_space<vmem>>, vector<64x1xf32>
    %4 = vector.broadcast %3 : vector<64x1xf32> to vector<64x128xf32>
    %5 = arith.addf %2, %4 : vector<64x128xf32>
    %6 = vector.extract_strided_slice %5 {offsets = [0, 0], sizes = [32, 128], strides = [1, 1]} : vector<64x128xf32> to vector<32x128xf32>
    %7 = math.tanh %6 : vector<32x128xf32>
    %8 = vector.extract_strided_slice %5 {offsets = [32, 0], sizes = [32, 128], strides = [1, 1]} : vector<64x128xf32> to vector<32x128xf32>
    %9 = arith.negf %8 : vector<32x128xf32>
    %10 = math.exp %9 : vector<32x128xf32>
    %cst_5 = arith.constant 1.000000e+00 : f32
    %11 = vector.broadcast %cst_5 : f32 to vector<32x128xf32>
    %12 = arith.addf %11, %10 : vector<32x128xf32>
    %13 = arith.divf %11, %12 : vector<32x128xf32>
    %14 = arith.mulf %7, %13 : vector<32x128xf32>
    %c0_6 = arith.constant 0 : index
    %c0_7 = arith.constant 0 : index
    %15 = vector.load %arg4[%c0_6, %c0_7] : memref<32x128xf32, #tpu.memory_space<vmem>>, vector<32x128xf32>
    tpu.vector_store %arg4[%c0_6, %c0_7], %14 {strides = array<i32>} : memref<32x128xf32, #tpu.memory_space<vmem>>, vector<32x128xf32>,
    return
  }
  func.func @transform_0(%arg0: i32) -> (i32, i32) {
    %c0_i32 = arith.constant 0 : i32
    %c0_i32_0 = arith.constant 0 : i32
    return %c0_i32, %arg0 : i32, i32
  }
  func.func @transform_1(%arg0: i32) -> (i32, i32) {
    %c0_i32 = arith.constant 0 : i32
    %c0_i32_0 = arith.constant 0 : i32
    %c0_i32_1 = arith.constant 0 : i32
    return %c0_i32, %c0_i32_0 : i32, i32
  }
  func.func @transform_2(%arg0: i32) -> (i32, i32) {
    %c0_i32 = arith.constant 0 : i32
    %c0_i32_0 = arith.constant 0 : i32
    %c0_i32_1 = arith.constant 0 : i32
    return %c0_i32, %c0_i32_0 : i32, i32
  }
  func.func @transform_3(%arg0: i32) -> (i32, i32) {
    %c0_i32 = arith.constant 0 : i32
    %c0_i32_0 = arith.constant 0 : i32
    return %c0_i32, %arg0 : i32, i32
  }
}

</mosaic_0001>

<bundles_post_ra>
// kernel: merge_forward.1
= control target key start
LH: loop header
LB: loop body
LE: loop exit
PB: predicated region body
PF: predicated region fallthrough
CT: control target
= control target key end

     0   :  { %s1346_s0 = inlined_call_operand.vmem [shape: f32[128,128], index: 0, kind: input, shape index: {}]   ;;  %s1347_s1 = inlined_call_operand.vmem [shape: f32[64,128], index: 1, kind: input, shape index: {}]   ;;  %s1348_s2 = inlined_call_operand.vmem [shape: f32[64,1], index: 2, kind: input, shape index: {}]   ;;  %s1349_s3 = inlined_call_operand.vmem [shape: f32[32,128], index: 3, kind: output, shape index: {}]  }
   0x1   :  { %v37_v0 = vld [vmem:[%s1346_s0 + $0x78] sm:$0xff]  ;;  %v36_v1 = vld [vmem:[%s1346_s0 + $0x70] sm:$0xff]  ;;  %v35_v2 = vld [vmem:[%s1346_s0 + $0x68] sm:$0xff] }
   0x2   :  { %v830_v3 = vand.u32 4294901760, %v37_v0  ;;  %v832_v4 = vand.u32 4294901760, %v36_v1  ;;  %v834_v5 = vand.u32 4294901760, %v35_v2  ;;  %v34_v6 = vld [vmem:[%s1346_s0 + $0x60] sm:$0xff]  ;;  %v33_v7 = vld [vmem:[%s1346_s0 + $0x58] sm:$0xff]  ;;  %v32_v8 = vld [vmem:[%s1346_s0 + $0x50] sm:$0xff] }
   0x3   :  { %v845_v9 = vand.u32 4294901760, %v34_v6  ;;  %v847_v10 = vand.u32 4294901760, %v33_v7  ;;  %v849_v11 = vand.u32 4294901760, %v32_v8  ;;  %v31_v12 = vld [vmem:[%s1346_s0 + $0x48] sm:$0xff]  ;;  %v30_v13 = vld [vmem:[%s1346_s0 + $0x40] sm:$0xff]  ;;  %v29_v17 = vld [vmem:[%s1346_s0 + $0x38] sm:$0xff] }
   0x4   :  { %740 = vmatpush.msra.mxu2 %v830_v3  ;;  %v859_v14 = vsub.f32 %v37_v0, %v830_v3  ;;  %v862_v15 = vsub.f32 %v36_v1, %v832_v4  ;;  %v865_v16 = vsub.f32 %v35_v2, %v834_v5  ;;  %87 = vmatpush.msra.mxu0 %v830_v3  ;;  %v871_v18 = vand.u32 4294901760, %v31_v12  ;;  %v28_v25 = vld [vmem:[%s1346_s0 + $0x30] sm:$0xff]  ;;  %v27_v33 = vld [vmem:[%s1346_s0 + $0x28] sm:$0xff]  ;;  %v26_v42 = vld [vmem:[%s1346_s0 + $0x20] sm:$0xff] }
   0x5   :  { %v874_v19 = vsub.f32 %v34_v6, %v845_v9  ;;  %v877_v20 = vsub.f32 %v33_v7, %v847_v10  ;;  %v883_v24 = vand.u32 4294901760, %v30_v13  ;;  %v890_v27 = vand.u32 4294901760, %v29_v17  ;;  %v18_v47 = vld [vmem:[%s1347_s1 + $0x20] sm:$0xff]  ;;  %v25_v49 = vld [vmem:[%s1346_s0 + $0x18] sm:$0xff]  ;;  %v24_v55 = vld [vmem:[%s1346_s0 + $0x10] sm:$0xff] }
   0x6   :  { %741 = vmatpush.msra.mxu2 %v832_v4  ;;  %v185_v21 = vand.u32 4294901760, %v859_v14  ;;  %v191_v22 = vand.u32 4294901760, %v862_v15  ;;  %v197_v23 = vand.u32 4294901760, %v865_v16  ;;  %89 = vmatpush.msra.mxu0 %v832_v4  ;;  %v893_v28 = vsub.f32 %v32_v8, %v849_v11  ;;  %v23_v62 = vld [vmem:[%s1346_s0 + $0x8] sm:$0xff]  ;;  %v22_v2 = vld [vmem:[%s1346_s0] sm:$0xff] }
   0x7   :  { %v203_v26 = vand.u32 4294901760, %v874_v19  ;;  %v209_v32 = vand.u32 4294901760, %v877_v20  ;;  %v913_v35 = vand.u32 4294901760, %v28_v25  ;;  %v916_v36 = vsub.f32 %v31_v12, %v871_v18  ;;  %v14_v12 = vld [vmem:[%s1347_s1] sm:$0xff] }
   0x8   :  { %742 = vmatpush.msra.mxu2 %v834_v5  ;;  %v186_v29 = vsub.f32 %v859_v14, %v185_v21  ;;  %v192_v30 = vsub.f32 %v862_v15, %v191_v22  ;;  %v198_v31 = vsub.f32 %v865_v16, %v197_v23  ;;  %91 = vmatpush.msra.mxu0 %v834_v5  ;;  %v215_v39 = vand.u32 4294901760, %v893_v28 }
   0x9   :  { %v204_v34 = vsub.f32 %v874_v19, %v203_v26  ;;  %v922_v40 = vsub.f32 %v30_v13, %v883_v24  ;;  %v924_v41 = vand.u32 4294901760, %v27_v33  ;;  %v210_v44 = vsub.f32 %v877_v20, %v209_v32 }
   0xa   :  { %743 = vmatpush.msra.mxu2 %v845_v9  ;;  %v187_v37 = vand.u32 4294901760, %v186_v29  ;;  %v193_v38 = vand.u32 4294901760, %v192_v30  ;;  %93 = vmatpush.msra.mxu0 %v845_v9  ;;  %v199_v43 = vand.u32 4294901760, %v198_v31  ;;  %v221_v45 = vand.u32 4294901760, %v916_v36  ;;  %v19_v30 = vld [vmem:[%s1347_s1 + $0x28] sm:$0xff] }
   0xb   :  { %v935_v46 = vsub.f32 %v29_v17, %v890_v27  ;;  %v227_v48 = vand.u32 4294901760, %v922_v40  ;;  %v205_v50 = vand.u32 4294901760, %v204_v34  ;;  %v216_v51 = vsub.f32 %v893_v28, %v215_v39 }
   0xc   :  { %744 = vmatpush.msra.mxu2 %v847_v10  ;;  %756 = vmatpush.msra.mxu3 %v187_v37  ;;  %v949_v52 = vand.u32 4294901760, %v26_v42  ;;  %v952_v53 = vsub.f32 %v28_v25, %v913_v35  ;;  %v959_v56 = vand.u32 4294901760, %v18_v47  ;;  %v211_v57 = vand.u32 4294901760, %v210_v44 }
   0xd   :  { %188 = vmatpush.msra.mxu1 %v187_v37  ;;  %95 = vmatpush.msra.mxu0 %v847_v10  ;;  %v233_v54 = vand.u32 4294901760, %v935_v46  ;;  %v222_v58 = vsub.f32 %v916_v36, %v221_v45  ;;  %v965_v59 = vand.u32 4294901760, %v25_v49  ;;  %v968_v60 = vsub.f32 %v27_v33, %v924_v41 }
   0xe   :  { %745 = vmatpush.msra.mxu2 %v849_v11  ;;  %757 = vmatpush.msra.mxu3 %v193_v38  ;;  %v228_v61 = vsub.f32 %v922_v40, %v227_v48  ;;  %v217_v63 = vand.u32 4294901760, %v216_v51  ;;  %v978_v0 = vand.u32 4294901760, %v24_v55  ;;  %v239_v1 = vand.u32 4294901760, %v952_v53 }
   0xf   :  { %194 = vmatpush.msra.mxu1 %v193_v38  ;;  %97 = vmatpush.msra.mxu0 %v849_v11  ;;  %v985_v6 = vsub.f32 %v26_v42, %v949_v52  ;;  %v234_v7 = vsub.f32 %v935_v46, %v233_v54  ;;  %v992_v8 = vsub.f32 %v18_v47, %v959_v56  ;;  %v223_v13 = vand.u32 4294901760, %v222_v58 }
  0x10   :  { %746 = vmatpush.msra.mxu2 %v871_v18  ;;  %758 = vmatpush.msra.mxu3 %v199_v43  ;;  %v998_v17 = vand.u32 4294901760, %v23_v62  ;;  %v1353_v25 = vand.u32 4294901760, %v968_v60  ;;  %v1002_v29 = vsub.f32 %v25_v49, %v965_v59  ;;  %v229_v31 = vand.u32 4294901760, %v228_v61 }
  0x11   :  { %200 = vmatpush.msra.mxu1 %v199_v43  ;;  %99 = vmatpush.msra.mxu0 %v871_v18  ;;  %v1007_v33 = vand.u32 4294901760, %v22_v2  ;;  %v240_v34 = vsub.f32 %v952_v53, %v239_v1  ;;  %v1352_v37 = vand.u32 4294901760, %v985_v6  ;;  %v1016_v38 = vsub.f32 %v24_v55, %v978_v0 }
  0x12   :  { %747 = vmatpush.msra.mxu2 %v883_v24  ;;  %759 = vmatpush.msra.mxu3 %v205_v50  ;;  %v1018_v42 = vand.u32 4294901760, %v14_v12  ;;  %v235_v43 = vand.u32 4294901760, %v234_v7  ;;  %v1350_v44 = vand.u32 4294901760, %v992_v8  ;;  %v1022_v47 = vand.u32 4294901760, %v19_v30 }
  0x13   :  { %206 = vmatpush.msra.mxu1 %v205_v50  ;;  %101 = vmatpush.msra.mxu0 %v883_v24  ;;  %v246_v49 = vsub.f32 %v968_v60, %v1353_v25  ;;  %v1351_v50 = vand.u32 4294901760, %v1002_v29  ;;  %v1030_v51 = vsub.f32 %v23_v62, %v998_v17  ;;  %v252_v58 = vsub.f32 %v985_v6, %v1352_v37 }
  0x14   :  { %748 = vmatpush.msra.mxu2 %v890_v27  ;;  %760 = vmatpush.msra.mxu3 %v211_v57  ;;  %v1033_v55 = vsub.f32 %v14_v12, %v1018_v42  ;;  %v1354_v61 = vand.u32 4294901760, %v1016_v38  ;;  %v153_v62 = vsub.f32 %v992_v8, %v1350_v44  ;;  %v1049_v7 = vsub.f32 %v19_v30, %v1022_v47 }
  0x15   :  { %212 = vmatpush.msra.mxu1 %v211_v57  ;;  %103 = vmatpush.msra.mxu0 %v890_v27  ;;  %v241_v57 = vand.u32 4294901760, %v240_v34  ;;  %v1356_v34 = vand.u32 4294901760, %v1030_v51  ;;  %v253_v30 = vand.u32 4294901760, %v252_v58 }
  0x16   :  { %749 = vmatpush.msra.mxu2 %v913_v35  ;;  %761 = vmatpush.msra.mxu3 %v217_v63  ;;  %v1355_v12 = vand.u32 4294901760, %v1033_v55  ;;  %v1358_v37 = vand.u32 4294901760, %v1049_v7 }
  0x17   :  { %218 = vmatpush.msra.mxu1 %v217_v63  ;;  %105 = vmatpush.msra.mxu0 %v913_v35  ;;  %v1042_v63 = vsub.f32 %v22_v2, %v1007_v33  ;;  %v258_v2 = vsub.f32 %v1002_v29, %v1351_v50  ;;  %v154_v50 = vand.u32 4294901760, %v153_v62 }
  0x18   :  { %750 = vmatpush.msra.mxu2 %v924_v41  ;;  %762 = vmatpush.msra.mxu3 %v223_v13 }
  0x19   :  { %224 = vmatpush.msra.mxu1 %v223_v13  ;;  %107 = vmatpush.msra.mxu0 %v924_v41  ;;  %v247_v13 = vand.u32 4294901760, %v246_v49  ;;  %v264_v49 = vsub.f32 %v1016_v38, %v1354_v61  ;;  %v1357_v44 = vand.u32 4294901760, %v1042_v63  ;;  %v259_v58 = vand.u32 4294901760, %v258_v2 }
  0x1a   :  { %751 = vmatpush.msra.mxu2 %v949_v52  ;;  %763 = vmatpush.msra.mxu3 %v229_v31  ;;  %v270_v61 = vsub.f32 %v1030_v51, %v1356_v34  ;;  %v161_v2 = vsub.f32 %v1049_v7, %v1358_v37 }
  0x1b   :  { %230 = vmatpush.msra.mxu1 %v229_v31  ;;  %109 = vmatpush.msra.mxu0 %v949_v52  ;;  %v20_v31 = vld [vmem:[%s1347_s1 + $0x30] sm:$0xff]  ;;  %v276_v62 = vsub.f32 %v1042_v63, %v1357_v44  ;;  %v21_v44 = vld [vmem:[%s1347_s1 + $0x38] sm:$0xff] }
  0x1c   :  { %752 = vmatpush.msra.mxu2 %v965_v59  ;;  %764 = vmatpush.msra.mxu3 %v235_v43  ;;  %v1071_v25 = vand.u32 4294901760, %v20_v31  ;;  %v1100_v37 = vand.u32 4294901760, %v21_v44 }
  0x1d   :  { %236 = vmatpush.msra.mxu1 %v235_v43  ;;  %111 = vmatpush.msra.mxu0 %v965_v59  ;;  %v121_v43 = vsub.f32 %v1033_v55, %v1355_v12  ;;  %v15_v12 = vld [vmem:[%s1347_s1 + $0x8] sm:$0xff] }
  0x1e   :  { %753 = vmatpush.msra.mxu2 %v978_v0  ;;  %765 = vmatpush.msra.mxu3 %v241_v57  ;;  %v1089_v34 = vsub.f32 %v20_v31, %v1071_v25 }
  0x1f   :  { %242 = vmatpush.msra.mxu1 %v241_v57  ;;  %113 = vmatpush.msra.mxu0 %v978_v0  ;;  %v265_v57 = vand.u32 4294901760, %v264_v49  ;;  %v271_v49 = vand.u32 4294901760, %v270_v61 }
  0x20   :  { %754 = vmatpush.msra.mxu2 %v998_v17  ;;  %766 = vmatpush.msra.mxu3 %v247_v13  ;;  %v168_v31 = vand.u32 4294901760, %v1089_v34 }
  0x21   :  { %248 = vmatpush.msra.mxu1 %v247_v13  ;;  %115 = vmatpush.msra.mxu0 %v998_v17  ;;  %v122_v13 = vand.u32 4294901760, %v121_v43  ;;  %v162_v43 = vand.u32 4294901760, %v161_v2 }
  0x22   :  { %755 = vmatpush.msra.mxu2 %v1007_v33  ;;  %767 = vmatpush.msra.mxu3 %v253_v30 }
  0x23   :  { %155 = vmatmul.f32.vlgmr.msra.gmra.mxu2 %v154_v50  ;;  %254 = vmatpush.msra.mxu1 %v253_v30  ;;  %v1096_v50 = vand.u32 4294901760, %v15_v12  ;;  %v277_v30 = vand.u32 4294901760, %v276_v62 }
  0x24   :  { %768 = vmatpush.msra.mxu3 %v259_v58  ;;  %314 = vmatpush.msrb.mxu2 %v859_v14 }
  0x25   :  { %260 = vmatpush.msra.mxu1 %v259_v58  ;;  %117 = vmatpush.msra.mxu0 %v1007_v33  ;;  %v1106_v61 = vsub.f32 %v15_v12, %v1096_v50  ;;  %v169_v58 = vsub.f32 %v1089_v34, %v168_v31 }
  0x26   :  { %769 = vmatpush.msra.mxu3 %v265_v57  ;;  %317 = vmatpush.msrb.mxu2 %v862_v15 }
  0x27   :  { %266 = vmatpush.msra.mxu1 %v265_v57  ;;  %123 = vmatmul.f32.vlgmr.msra.gmra.mxu0 %v122_v13  ;;  %v1114_v57 = vsub.f32 %v21_v44, %v1100_v37  ;;  %v128_v14 = vand.u32 4294901760, %v1106_v61  ;;  %v170_v44 = vand.u32 4294901760, %v169_v58  ;;  %v17_v13 = vld [vmem:[%s1347_s1 + $0x18] sm:$0xff] }
  0x28   :  { %770 = vmatpush.msra.mxu3 %v271_v49  ;;  %320 = vmatpush.msrb.mxu2 %v865_v16 }
  0x29   :  { %272 = vmatpush.msra.mxu1 %v271_v49  ;;  %485 = vmatpush.msrb.mxu0 %v185_v21  ;;  %v16_v21 = vld [vmem:[%s1347_s1 + $0x10] sm:$0xff]  ;;  %v176_v12 = vand.u32 4294901760, %v1114_v57  ;;  %v129_v62 = vsub.f32 %v1106_v61, %v128_v14 }
  0x2a   :  { %771 = vmatpush.msra.mxu3 %v277_v30  ;;  %323 = vmatpush.msrb.mxu2 %v874_v19  ;;  %v1132_v15 = vand.u32 4294901760, %v16_v21  ;;  %v1165_v19 = vand.u32 4294901760, %v17_v13 }
  0x2b   :  { %163 = vmatmul.f32.gmra.mxu2 %v162_v43  ;;  %296 = vmatmul.f32.vlgmr.msra.gmra.mxu3 %v959_v56  ;;  %v177_v16 = vsub.f32 %v1114_v57, %v176_v12  ;;  %v130_v2 = vand.u32 4294901760, %v129_v62 }
  0x2c   :  { %402 = vmatpush.msrb.mxu3 %v830_v3  ;;  %326 = vmatpush.msrb.mxu2 %v877_v20 }
  0x2d   :  { %278 = vmatpush.msra.mxu1 %v277_v30  ;;  %489 = vmatpush.msrb.mxu0 %v191_v22  ;;  %v800_v22 = vmov 0   ;;  %v178_v49 = vand.u32 4294901760, %v177_v16 }
  0x2e   :  { %404 = vmatpush.msrb.mxu3 %v832_v4  ;;  %329 = vmatpush.msrb.mxu2 %v893_v28  ;;  %v1360_v28 = vand.u32 4294901760, %v985_v6 }
  0x2f   :  { %280 = vmatmul.f32.vlgmr.msra.gmra.mxu1 %v1018_v42  ;;  %493 = vmatpush.msrb.mxu0 %v197_v23  ;;  %v1151_v23 = vsub.f32 %v16_v21, %v1132_v15 }
  0x30   :  { %406 = vmatpush.msrb.mxu3 %v834_v5  ;;  %332 = vmatpush.msrb.mxu2 %v916_v36  ;;  %v1361_v36 = vand.u32 4294901760, %v1033_v55 }
  0x31   :  { %580 = vmatpush.msrb.mxu1 %v830_v3  ;;  %773 = vset.pattern.permute.xlu0 %v800_v22  ;;  %v42_v3 = vld [vmem:[%s1348_s2 + $0x20] sm:$0xff] }
  0x32   :  { %408 = vmatpush.msrb.mxu3 %v845_v9  ;;  %335 = vmatpush.msrb.mxu2 %v922_v40  ;;  %v1363_v40 = vand.u32 4294901760, %v1016_v38 }
  0x33   :  { %171 = vmatmul.f32.gmra.mxu2 %v170_v44  ;;  %300 = vmatmul.f32.gmra.mxu3 %v1022_v47 }
  0x34   :  { %410 = vmatpush.msrb.mxu3 %v847_v10  ;;  %338 = vmatpush.msrb.mxu2 %v935_v46  ;;  %v1365_v46 = vand.u32 4294901760, %v1042_v63 }
  0x35   :  { %582 = vmatpush.msrb.mxu1 %v832_v4  ;;  %497 = vmatpush.msrb.mxu0 %v203_v26  ;;  %v136_v4 = vand.u32 4294901760, %v1151_v23  ;;  %v1178_v26 = vsub.f32 %v17_v13, %v1165_v19 }
  0x36   :  { %412 = vmatpush.msrb.mxu3 %v849_v11  ;;  %341 = vmatpush.msrb.mxu2 %v952_v53  ;;  %v1366_v53 = vand.u32 4294901760, %v992_v8 }
  0x37   :  { %584 = vmatpush.msrb.mxu1 %v834_v5  ;;  %68 = vperm.xlu0 %773, %v42_v3   ;;  %v137_v5 = vsub.f32 %v1151_v23, %v136_v4 }
  0x38   :  { %414 = vmatpush.msrb.mxu3 %v871_v18  ;;  %344 = vmatpush.msrb.mxu2 %v968_v60 }
  0x39   :  { %131 = vmatmul.f32.gmra.mxu0 %v130_v2  ;;  %586 = vmatpush.msrb.mxu1 %v845_v9  ;;  %v43_v9 = vld [vmem:[%s1348_s2 + $0x28] sm:$0xff]  ;;  %v138_v20 = vand.u32 4294901760, %v137_v5 }
  0x3a   :  { %416 = vmatpush.msrb.mxu3 %v883_v24  ;;  %347 = vmatpush.msrb.mxu2 %v985_v6 }
  0x3b   :  { %179 = vmatmul.f32.gmra.mxu2 %v178_v49  ;;  %304 = vmatmul.f32.gmra.mxu3 %v1071_v25 }
  0x3c   :  { %418 = vmatpush.msrb.mxu3 %v890_v27  ;;  %501 = vmatpush.msrb.mxu0 %v209_v32  ;;  %v144_v32 = vand.u32 4294901760, %v1178_v26 }
  0x3d   :  { %350 = vmatpush.msrb.mxu2 %v1002_v29  ;;  %284 = vmatmul.f32.gmra.mxu1 %v1096_v50 }
  0x3e   :  { %420 = vmatpush.msrb.mxu3 %v913_v35  ;;  %505 = vmatpush.msrb.mxu0 %v215_v39  ;;  %v1362_v39 = vand.u32 4294901760, %v1002_v29 }
  0x3f   :  { %588 = vmatpush.msrb.mxu1 %v847_v10  ;;  %353 = vmatpush.msrb.mxu2 %v1016_v38  ;;  %v145_v10 = vsub.f32 %v1178_v26, %v144_v32 }
  0x40   :  { %422 = vmatpush.msrb.mxu3 %v924_v41  ;;  %509 = vmatpush.msrb.mxu0 %v221_v45  ;;  %v1364_v45 = vand.u32 4294901760, %v1030_v51 }
  0x41   :  { %590 = vmatpush.msrb.mxu1 %v849_v11  ;;  %356 = vmatpush.msrb.mxu2 %v1030_v51  ;;  %v44_v11 = vld [vmem:[%s1348_s2 + $0x30] sm:$0xff] }
  0x42   :  { %424 = vmatpush.msrb.mxu3 %v949_v52  ;;  %513 = vmatpush.msrb.mxu0 %v227_v48  ;;  %v41_v48 = vld [vmem:[%s1348_s2 + $0x18] sm:$0xff] }
  0x43   :  { %592 = vmatpush.msrb.mxu1 %v871_v18  ;;  %73 = vperm.xlu0 %773, %v43_v9   ;;  %v146_v18 = vand.u32 4294901760, %v145_v10 }
  0x44   :  { %359 = vmatpush.msrb.mxu2 %v1042_v63  ;;  %139 = vmatmul.f32.gmra.mxu0 %v138_v20 }
  0x45   :  { %308 = vmatmul.f32.gmra.mxu3 %v1100_v37  ;;  %362 = vmatmul.f32.vlgmr.msrb.gmra.mxu2 %v1033_v55 }
  0x46   :  { %426 = vmatpush.msrb.mxu3 %v965_v59  ;;  %517 = vmatpush.msrb.mxu0 %v233_v54  ;;  %v1367_v54 = vand.u32 4294901760, %v1049_v7 }
  0x47   :  { %594 = vmatpush.msrb.mxu1 %v883_v24  ;;  %774 = vset.pattern.permute.xlu1 %v800_v22  ;;  %v1359_v24 = vand.u32 4294901760, %v968_v60 }
  0x48   :  { %288 = vmatmul.f32.gmra.mxu1 %v1132_v15  ;;  %428 = vmatpush.msrb.mxu3 %v978_v0 }
  0x49   :  { %521 = vmatpush.msrb.mxu0 %v239_v1  ;;  %596 = vmatpush.msrb.mxu1 %v890_v27  ;;  %v40_v27 = vld [vmem:[%s1348_s2 + $0x10] sm:$0xff] }
  0x4a   :  { %78 = vperm.xlu1 %774, %v44_v11   ;;  %430 = vmatpush.msrb.mxu3 %v998_v17 }
  0x4b   :  { %525 = vmatpush.msrb.mxu0 %v1359_v24  ;;  %598 = vmatpush.msrb.mxu1 %v913_v35  ;;  %v45_v35 = vld [vmem:[%s1348_s2 + $0x38] sm:$0xff] }
  0x4c   :  { %432 = vmatpush.msrb.mxu3 %v1007_v33  ;;  %147 = vmatmul.f32.gmra.mxu0 %v146_v18 }
  0x4d   :  { %529 = vmatpush.msrb.mxu0 %v1360_v28  ;;  %600 = vmatpush.msrb.mxu1 %v924_v41  ;;  %v38_v41 = vld [vmem:[%s1348_s2] sm:$0xff] }
  0x4e   :  { %367 = vmatmul.f32.gmra.mxu2 %v1106_v61  ;;  %436 = vmatmul.f32.vlgmr.msrb.gmra.mxu3 %v1361_v36 }
  0x4f   :  { %533 = vmatpush.msrb.mxu0 %v1362_v39  ;;  %602 = vmatpush.msrb.mxu1 %v949_v52  ;;  %v39_v52 = vld [vmem:[%s1348_s2 + $0x8] sm:$0xff] }
  0x50   :  { %292 = vmatmul.f32.gmra.mxu1 %v1165_v19  ;;  %58 = vperm.xlu0 %773, %v40_v27  }
  0x51   :  { %537 = vmatpush.msrb.mxu0 %v1363_v40  ;;  %604 = vmatpush.msrb.mxu1 %v965_v59 }
  0x52   :  { %83 = vperm.xlu1 %774, %v45_v35   ;;  %775 = vset.pattern.permute.xlu2 %v800_v22 }
  0x53   :  { %541 = vmatpush.msrb.mxu0 %v1364_v45  ;;  %606 = vmatpush.msrb.mxu1 %v978_v0 }
  0x54   :  { %48 = vperm.xlu2 %775, %v38_v41  }
  0x55   :  { %545 = vmatpush.msrb.mxu0 %v1365_v46  ;;  %608 = vmatpush.msrb.mxu1 %v998_v17 }
  0x56   :  { %372 = vmatmul.f32.gmra.mxu2 %v1151_v23  ;;  %442 = vmatmul.f32.gmra.mxu3 %v128_v14 }
  0x57   :  { %547 = vmatmul.f32.vlgmr.msrb.gmra.mxu0 %v1018_v42  ;;  %610 = vmatpush.msrb.mxu1 %v1007_v33 }
  0x58   :  { %612 = vmatmul.f32.vlgmr.msrb.gmra.mxu1 %v1018_v42 }
  0x5a   :  { %63 = vperm.xlu1 %774, %v41_v48  }
  0x5c   :  { %53 = vperm.xlu2 %775, %v39_v52  }
  0x5e   :  { %377 = vmatmul.f32.gmra.mxu2 %v1178_v26  ;;  %448 = vmatmul.f32.gmra.mxu3 %v136_v4 }
  0x5f   :  { %551 = vmatmul.f32.gmra.mxu0 %v1096_v50 }
  0x60   :  { %616 = vmatmul.f32.gmra.mxu1 %v1096_v50 }
  0x66   :  { %382 = vmatmul.f32.gmra.mxu2 %v992_v8  ;;  %454 = vmatmul.f32.gmra.mxu3 %v144_v32 }
  0x67   :  { %555 = vmatmul.f32.gmra.mxu0 %v1132_v15 }
  0x68   :  { %620 = vmatmul.f32.gmra.mxu1 %v1132_v15 }
  0x6e   :  { %387 = vmatmul.f32.gmra.mxu2 %v1049_v7  ;;  %460 = vmatmul.f32.gmra.mxu3 %v1366_v53 }
  0x6f   :  { %559 = vmatmul.f32.gmra.mxu0 %v1165_v19 }
  0x70   :  { %624 = vmatmul.f32.gmra.mxu1 %v1165_v19 }
  0x76   :  { %392 = vmatmul.f32.gmra.mxu2 %v1089_v34  ;;  %466 = vmatmul.f32.gmra.mxu3 %v1367_v54 }
  0x77   :  { %563 = vmatmul.f32.gmra.mxu0 %v959_v56 }
  0x78   :  { %628 = vmatmul.f32.gmra.mxu1 %v959_v56 }
  0x7e   :  { %397 = vmatmul.f32.gmra.mxu2 %v1114_v57  ;;  %472 = vmatmul.f32.gmra.mxu3 %v168_v31 }
  0x7f   :  { %567 = vmatmul.f32.gmra.mxu0 %v1022_v47 }
  0x80   :  { %632 = vmatmul.f32.gmra.mxu1 %v1022_v47 }
  0x86   :  { %478 = vmatmul.f32.gmra.mxu3 %v176_v12 }
  0x87   :  { %571 = vmatmul.f32.gmra.mxu0 %v1071_v25 }
  0x88   :  { %636 = vmatmul.f32.gmra.mxu1 %v1071_v25 }
  0x8f   :  { %575 = vmatmul.f32.gmra.mxu0 %v1100_v37 }
  0x90   :  { %640 = vmatmul.f32.gmra.mxu1 %v1100_v37 }
  0xa4   :  { %v124_v59 = vpop.f32.mrf.mxu0 }
  0xa6   :  { %v156_v56 = vpop.f32.mrf.mxu2 }
  0xa9   :  { %v69_v8 = vpop.permute.xlu0 %68 }
  0xaa   :  { %v157_v10 = vadd.f32 %v156_v56, %v69_v8 }
  0xac   :  { %v281_v6 = vpop.f32.mrf.mxu1 }
  0xae   :  { %v164_v60 = vpop.f32.mrf.mxu2  ;;  %v297_v0 = vpop.f32.mrf.mxu3 }
  0xaf   :  { %v49_v1 = vpop.permute.xlu2 %48  ;;  %v298_v24 = vadd.f32 %v297_v0, %v157_v10 }
  0xb0   :  { %v125_v17 = vadd.f32 %v124_v59, %v49_v1 }
  0xb2   :  { %v1292_v29 = vadd.f32 %v281_v6, %v125_v17 }
  0xb5   :  { %v74_v25 = vpop.permute.xlu0 %73 }
  0xb6   :  { %v172_v33 = vpop.f32.mrf.mxu2  ;;  %v301_v38 = vpop.f32.mrf.mxu3  ;;  %v165_v39 = vadd.f32 %v164_v60, %v74_v25 }
  0xb7   :  { %v54_v42 = vpop.permute.xlu2 %53  ;;  %v132_v47 = vpop.f32.mrf.mxu0 }
  0xb8   :  { %v133_v51 = vadd.f32 %v132_v47, %v54_v42  ;;  %v302_v46 = vadd.f32 %v301_v38, %v165_v39 }
  0xba   :  { %v285_v55 = vpop.f32.mrf.mxu1 }
  0xbb   :  { %v1294_v63 = vadd.f32 %v285_v55, %v133_v51 }
  0xbc   :  { %v79_v37 = vpop.permute.xlu1 %78 }
  0xbd   :  { %v173_v59 = vadd.f32 %v172_v33, %v79_v37 }
  0xbe   :  { %v180_v7 = vpop.f32.mrf.mxu2  ;;  %v305_v34 = vpop.f32.mrf.mxu3 }
  0xbf   :  { %v306_v17 = vadd.f32 %v305_v34, %v173_v59 }
  0xc1   :  { %v140_v50 = vpop.f32.mrf.mxu0 }
  0xc2   :  { %v59_v30 = vpop.permute.xlu0 %58 }
  0xc3   :  { %v141_v43 = vadd.f32 %v140_v50, %v59_v30 }
  0xc4   :  { %v84_v31 = vpop.permute.xlu1 %83 }
  0xc5   :  { %v289_v61 = vpop.f32.mrf.mxu1  ;;  %v181_v38 = vadd.f32 %v180_v7, %v84_v31 }
  0xc6   :  { %v1296_v58 = vadd.f32 %v289_v61, %v141_v43 }
  0xc8   :  { %v309_v57 = vpop.f32.mrf.mxu3  ;;  %v363_v14 = vpop.f32.mrf.mxu2 }
  0xc9   :  { %v148_v21 = vpop.f32.mrf.mxu0  ;;  %v364_v60 = vadd.f32 %v363_v14, %v1292_v29 }
  0xcc   :  { %v64_v44 = vpop.permute.xlu1 %63 }
  0xcd   :  { %v149_v12 = vadd.f32 %v148_v21, %v64_v44  ;;  %v293_v15 = vpop.f32.mrf.mxu1  ;;  %v310_v44 = vadd.f32 %v309_v57, %v181_v38 }
  0xcf   :  { %v1298_v22 = vadd.f32 %v293_v15, %v149_v12 }
  0xd1   :  { %v368_v62 = vpop.f32.mrf.mxu2  ;;  %v437_v16 = vpop.f32.mrf.mxu3 }
  0xd2   :  { %v438_v50 = vadd.f32 %v437_v16, %v364_v60  ;;  %v369_v15 = vadd.f32 %v368_v62, %v1294_v63 }
  0xd4   :  { %v548_v3 = vpop.f32.mrf.mxu0 }
  0xd5   :  { %v613_v23 = vpop.f32.mrf.mxu1  ;;  %v549_v12 = vadd.f32 %v548_v3, %v438_v50 }
  0xd7   :  { %v614_v7 = vadd.f32 %v613_v23, %v549_v12 }
  0xd9   :  { %v1300_v2 = vpop.f32.mrf.mxu2  ;;  %v443_v13 = vpop.f32.mrf.mxu3 }
  0xda   :  { %v444_v31 = vadd.f32 %v443_v13, %v369_v15  ;;  %v374_v23 = vadd.f32 %v1300_v2, %v1296_v58 }
  0xdc   :  { %v1302_v49 = vpop.f32.mrf.mxu0 }
  0xdd   :  { %v1304_v4 = vpop.f32.mrf.mxu1  ;;  %v553_v3 = vadd.f32 %v1302_v49, %v444_v31 }
  0xe1   :  { %v1306_v19 = vpop.f32.mrf.mxu2  ;;  %v1308_v5 = vpop.f32.mrf.mxu3 }
  0xe4   :  { %v1310_v26 = vpop.f32.mrf.mxu0 }
  0xe5   :  { %v1312_v9 = vpop.f32.mrf.mxu1 }
  0xe9   :  { %v383_v20 = vpop.f32.mrf.mxu2  ;;  %v1314_v32 = vpop.f32.mrf.mxu3 }
  0xea   :  { %v384_v28 = vadd.f32 %v383_v20, %v298_v24 }
  0xec   :  { %v1316_v11 = vpop.f32.mrf.mxu0 }
  0xed   :  { %v1318_v18 = vpop.f32.mrf.mxu1 }
  0xf1   :  { %v388_v27 = vpop.f32.mrf.mxu2  ;;  %v461_v36 = vpop.f32.mrf.mxu3 }
  0xf2   :  { %v462_v35 = vadd.f32 %v461_v36, %v384_v28  ;;  %v389_v52 = vadd.f32 %v388_v27, %v302_v46 }
  0xf4   :  { %v564_v40 = vpop.f32.mrf.mxu0 }
  0xf5   :  { %v565_v41 = vadd.f32 %v564_v40, %v462_v35  ;;  %v629_v45 = vpop.f32.mrf.mxu1 }
  0xf7   :  { %v630_v48 = vadd.f32 %v629_v45, %v565_v41 }
  0xf9   :  { %v736_v53 = vmul.f32 -1.442695, %v630_v48  ;;  %v467_v54 = vpop.f32.mrf.mxu3  ;;  %v393_v1 = vpop.f32.mrf.mxu2 }
  0xfa   :  { %v468_v56 = vadd.f32 %v467_v54, %v389_v52  ;;  %v394_v47 = vadd.f32 %v393_v1, %v306_v17  ;;  %v618_v52 = vadd.f32 %v1304_v4, %v553_v3  ;;  %v379_v17 = vadd.f32 %v1306_v19, %v1298_v22 }
  0xfb   :  { %776 = vpow2.f32 %v736_v53  ;;  %v450_v53 = vadd.f32 %v1308_v5, %v374_v23 }
  0xfc   :  { %v568_v6 = vpop.f32.mrf.mxu0 }
  0xfd   :  { %v569_v8 = vadd.f32 %v568_v6, %v468_v56  ;;  %v633_v0 = vpop.f32.mrf.mxu1 }
  0xff   :  { %v634_v42 = vadd.f32 %v633_v0, %v569_v8  ;;  %v557_v8 = vadd.f32 %v1310_v26, %v450_v53 }
 0x101   :  { %v777_v51 = vpop.eup %776  ;;  %v737_v25 = vmul.f32 -1.442695, %v634_v42  ;;  %v473_v55 = vpop.f32.mrf.mxu3 }
 0x102   :  { %v660_v30 = vadd.f32 1.0, %v777_v51  ;;  %v474_v43 = vadd.f32 %v473_v55, %v394_v47  ;;  %v398_v37 = vpop.f32.mrf.mxu2  ;;  %v622_v51 = vadd.f32 %v1312_v9, %v557_v8 }
 0x103   :  { %778 = vpow2.f32 %v737_v25  ;;  %v399_v29 = vadd.f32 %v398_v37, %v310_v44  ;;  %v456_v25 = vadd.f32 %v1314_v32, %v379_v17 }
 0x104   :  { %780 = vrcp.f32 %v660_v30  ;;  %v572_v33 = vpop.f32.mrf.mxu0  ;;  %v675_v63 = vand.u32 2147483648, %v660_v30  ;;  %v673_v40 = vand.u32 2147483647, %v660_v30  ;;  %vm669_vm1 = vweird.f32 %v660_v30 }
 0x105   :  { %v573_v61 = vadd.f32 %v572_v33, %v474_v43  ;;  %v637_v21 = vpop.f32.mrf.mxu1  ;;  %v561_v22 = vadd.f32 %v1316_v11, %v456_v25 }
 0x106   :  { %v676_v54 = vor.u32 1.1754944e-38, %v675_v63  ;;  %vm674_vm3 = vcmp.eq.f32.partialorder %v673_v40, 8.507059e+37 }
 0x107   :  { %v638_v34 = vadd.f32 %v637_v21, %v573_v61  ;;  %v626_v44 = vadd.f32 %v1318_v18, %v561_v22 }
 0x109   :  { %v779_v14 = vpop.eup %778  ;;  %v738_v20 = vmul.f32 -1.442695, %v638_v34  ;;  %v479_v10 = vpop.f32.mrf.mxu3 }
 0x10a   :  { %v781_v24 = vpop.eup %780  ;;  %v661_v16 = vadd.f32 1.0, %v779_v14  ;;  %v480_v28 = vadd.f32 %v479_v10, %v399_v29 }
 0x10b   :  { %v665_v27 = vmul.f32 %v781_v24, %v660_v30  ;;  %782 = vpow2.f32 %v738_v20  ;;  %vm670_vm0 = vweird.f32 %v781_v24 }
 0x10c   :  { %784 = vrcp.f32 %v661_v16  ;;  %v576_v36 = vpop.f32.mrf.mxu0  ;;  %vm671_vm2 = vmor %vm669_vm1, %vm670_vm0  ;;  %v690_v0 = vand.u32 2147483648, %v661_v16  ;;  %v688_v5 = vand.u32 2147483647, %v661_v16  ;;  %vm684_vm5 = vweird.f32 %v661_v16 }
 0x10d   :  { %v666_v39 = vsub.f32 1.0, %v665_v27  ;;  %v577_v35 = vadd.f32 %v576_v36, %v480_v28  ;;  %v641_v57 = vpop.f32.mrf.mxu1  ;;  %786 = vtanh.f32 %v614_v7 }
 0x10e   :  { %v691_v26 = vor.u32 1.1754944e-38, %v690_v0  ;;  %vm689_vm7 = vcmp.eq.f32.partialorder %v688_v5, 8.507059e+37 }
 0x10f   :  { %v667_v62 = vmul.f32 %v781_v24, %v666_v39  ;;  %v642_v41 = vadd.f32 %v641_v57, %v577_v35 }
 0x111   :  { %v783_v13 = vpop.eup %782  ;;  %v668_v45 = vadd.f32 %v781_v24, %v667_v62  ;;  %v739_v46 = vmul.f32 -1.442695, %v642_v41 }
 0x112   :  { %v785_v48 = vpop.eup %784  ;;  %v662_v49 = vadd.f32 1.0, %v783_v13 }
 0x113   :  { %v672_v59 = vsel %vm671_vm2, %v781_v24, %v668_v45  ;;  %v680_v56 = vmul.f32 %v785_v48, %v661_v16  ;;  %788 = vpow2.f32 %v739_v46  ;;  %v787_v1 = vpop.eup %786  ;;  %vm685_vm4 = vweird.f32 %v785_v48 }
 0x114   :  { %v677_v6 = vsel %vm674_vm3, %v676_v54, %v672_v59  ;;  %790 = vrcp.f32 %v662_v49  ;;  %vm686_vm6 = vmor %vm684_vm5, %vm685_vm4  ;;  %v705_v19 = vand.u32 2147483648, %v662_v49  ;;  %v703_v32 = vand.u32 2147483647, %v662_v49 }
 0x115   :  { %v724_v58 = vmul.f32 %v787_v1, %v677_v6  ;;  %v681_v2 = vsub.f32 1.0, %v680_v56  ;;  %792 = vtanh.f32 %v618_v52  ;;  %vm699_vm9 = vweird.f32 %v662_v49 }
 0x116   :  { %v706_v12 = vor.u32 1.1754944e-38, %v705_v19  ;;  %vm704_vm11 = vcmp.eq.f32.partialorder %v703_v32, 8.507059e+37 }
 0x117   :  { %728 = vst [vmem:[%s1349_s3] sm:$0xff] %v724_v58  ;;  %v682_v4 = vmul.f32 %v785_v48, %v681_v2 }
 0x119   :  { %v789_v42 = vpop.eup %788  ;;  %v683_v60 = vadd.f32 %v785_v48, %v682_v4 }
 0x11a   :  { %v791_v47 = vpop.eup %790  ;;  %v663_v55 = vadd.f32 1.0, %v789_v42 }
 0x11b   :  { %v687_v38 = vsel %vm686_vm6, %v785_v48, %v683_v60  ;;  %v695_v50 = vmul.f32 %v791_v47, %v662_v49  ;;  %v793_v30 = vpop.eup %792  ;;  %vm700_vm8 = vweird.f32 %v791_v47 }
 0x11c   :  { %v692_v43 = vsel %vm689_vm7, %v691_v26, %v687_v38  ;;  %794 = vrcp.f32 %v663_v55  ;;  %vm701_vm10 = vmor %vm699_vm9, %vm700_vm8  ;;  %v720_v10 = vand.u32 2147483648, %v663_v55  ;;  %v718_v7 = vand.u32 2147483647, %v663_v55 }
 0x11d   :  { %v725_v33 = vmul.f32 %v793_v30, %v692_v43  ;;  %v696_v37 = vsub.f32 1.0, %v695_v50  ;;  %796 = vtanh.f32 %v622_v51  ;;  %vm714_vm13 = vweird.f32 %v663_v55 }
 0x11e   :  { %798 = vtanh.f32 %v626_v44  ;;  %v721_v18 = vor.u32 1.1754944e-38, %v720_v10  ;;  %vm719_vm15 = vcmp.eq.f32.partialorder %v718_v7, 8.507059e+37 }
 0x11f   :  { %729 = vst [vmem:[%s1349_s3 + $0x8] sm:$0xff] %v725_v33  ;;  %v697_v9 = vmul.f32 %v791_v47, %v696_v37 }
 0x121   :  { %v698_v61 = vadd.f32 %v791_v47, %v697_v9 }
 0x122   :  { %v795_v21 = vpop.eup %794 }
 0x123   :  { %v702_v34 = vsel %vm701_vm10, %v791_v47, %v698_v61  ;;  %v710_v15 = vmul.f32 %v795_v21, %v663_v55  ;;  %v797_v29 = vpop.eup %796  ;;  %vm715_vm12 = vweird.f32 %v795_v21 }
 0x124   :  { %v707_v11 = vsel %vm704_vm11, %v706_v12, %v702_v34  ;;  %vm716_vm14 = vmor %vm714_vm13, %vm715_vm12  ;;  %v799_v28 = vpop.eup %798 }
 0x125   :  { %v726_v14 = vmul.f32 %v797_v29, %v707_v11  ;;  %v711_v20 = vsub.f32 1.0, %v710_v15 }
 0x127   :  { %730 = vst [vmem:[%s1349_s3 + $0x10] sm:$0xff] %v726_v14  ;;  %v712_v24 = vmul.f32 %v795_v21, %v711_v20 }
 0x129   :  { %v713_v31 = vadd.f32 %v795_v21, %v712_v24 }
 0x12b   :  { %v717_v16 = vsel %vm716_vm14, %v795_v21, %v713_v31 }
 0x12c   :  { %v722_v27 = vsel %vm719_vm15, %v721_v18, %v717_v16 }
 0x12d   :  { %v727_v36 = vmul.f32 %v799_v28, %v722_v27 }
 0x12f   :  { %731 = vst [vmem:[%s1349_s3 + $0x18] sm:$0xff] %v727_v36 }

</bundles_post_ra>
